<compile_context>
chip_gen: v5e
topology: v5e:2x2
jax: 0.10.0
libtpu: 0.0.40
codegen_flags: <defaults>
</compile_context>

<pallas_src>
import jax
import jax.numpy as jnp
from jax.experimental import pallas as pl
from jax.experimental.pallas import tpu as pltpu


# ---------------------------------------------------------------------------
# Parameter setup (mirrors PositionalEncoding.__init__) — plain JAX, runs once.
# ---------------------------------------------------------------------------
def make_pos_encoding(max_len: int, dmodel: int, padding_idx: int) -> jnp.ndarray:
    positions = jnp.arange(max_len, dtype=jnp.float32)[:, None]          # (L, 1)
    dimensions = jnp.arange(dmodel, dtype=jnp.float32)[None, :]          # (1, D)
    trig_fn_arg = positions / jnp.power(10000.0, 2.0 * dimensions / dmodel)
    even_mask = (jnp.arange(dmodel) % 2 == 0)[None, :]                   # (1, D)
    pe = jnp.where(even_mask, jnp.sin(trig_fn_arg), jnp.cos(trig_fn_arg))
    if padding_idx:  # matches PyTorch's truthiness check
        pe = pe.at[padding_idx].set(0.0)
    return pe  # (max_len, dmodel)


# ---------------------------------------------------------------------------
# Pallas kernels — operate on a lane-dense (rows, S*D) layout.
# ---------------------------------------------------------------------------
def _add_pe_kernel(x_ref, pos_ref, o_ref):
    # x_ref/o_ref: (TB, TL); pos_ref: (1, TL) broadcast over the row axis.
    o_ref[...] = x_ref[...] + pos_ref[...]


def _add_pe_dropout_kernel(x_ref, pos_ref, mask_ref, o_ref):
    # mask_ref already holds {0, 1/(1-p)} in the output dtype (inverted dropout),
    # so the whole forward is a fused add + multiply.
    o_ref[...] = (x_ref[...] + pos_ref[...]) * mask_ref[...]


# ---------------------------------------------------------------------------
# Wrapper
# ---------------------------------------------------------------------------
def _pick_tile(n: int, quantum: int, cap: int) -> int:
    """Largest t <= cap that divides n and is a multiple of quantum; else n (full)."""
    if n <= cap or n % quantum != 0:
        return n
    best = 0
    for t in range(quantum, cap + 1, quantum):
        if n % t == 0:
            best = t
    return best if best else n


def positional_encoding_forward(embedd: jnp.ndarray,
                                pos_encoding: jnp.ndarray,
                                *,
                                dropout_p: float,
                                rng_key=None,
                                training: bool = True) -> jnp.ndarray:
    """embedd: (B, S, D); pos_encoding: (max_len, D) float32."""
    B, S, D = embedd.shape
    dtype = embedd.dtype
    itemsize = jnp.dtype(dtype).itemsize
    L = S * D

    # Lane-dense views (free metadata reshapes).
    x2 = embedd.reshape(B, L)
    pos2 = pos_encoding[:S].astype(dtype).reshape(1, L)

    # Tile sizing: lane tile up to 16K elements; row tile keeps one block <= ~1 MiB
    # so with double-buffered x/mask/out the footprint stays well under the
    # 32 MiB scoped-VMEM budget (safe on v5e/v6e/v7x).
    tl = _pick_tile(L, 128, 16384)
    tb_cap = max(8, ((1 << 20) // max(1, tl * itemsize)) // 8 * 8)
    tb = _pick_tile(B, 8, tb_cap)
    grid = (B // tb, L // tl)

    x_spec = pl.BlockSpec((tb, tl), lambda i, j: (i, j))
    pos_spec = pl.BlockSpec((1, tl), lambda i, j: (0, j))
    out_spec = pl.BlockSpec((tb, tl), lambda i, j: (i, j))

    compiler_params = pltpu.CompilerParams(
        dimension_semantics=("parallel", "parallel"),
        vmem_limit_bytes=32 * 1024 * 1024,
    )

    p = float(dropout_p) if training else 0.0

    if p > 0.0:
        if rng_key is None:
            rng_key = jax.random.PRNGKey(0)
        keep_p = 1.0 - p
        scale = (1.0 / keep_p) if keep_p > 0.0 else 0.0   # p == 1 -> everything zeroed
        keep = jax.random.bernoulli(rng_key, keep_p, (B, L))
        mask = keep.astype(dtype) * jnp.asarray(scale, dtype)

        out2 = pl.pallas_call(
            _add_pe_dropout_kernel,
            out_shape=jax.ShapeDtypeStruct((B, L), dtype),
            grid=grid,
            in_specs=[x_spec, pos_spec, x_spec],
            out_specs=out_spec,
            compiler_params=compiler_params,
            cost_estimate=pl.CostEstimate(
                flops=2 * B * L,
                transcendentals=0,
                bytes_accessed=(3 * B * L + L) * itemsize),
        )(x2, pos2, mask)
    else:
        out2 = pl.pallas_call(
            _add_pe_kernel,
            out_shape=jax.ShapeDtypeStruct((B, L), dtype),
            grid=grid,
            in_specs=[x_spec, pos_spec],
            out_specs=out_spec,
            compiler_params=compiler_params,
            cost_estimate=pl.CostEstimate(
                flops=B * L,
                transcendentals=0,
                bytes_accessed=(2 * B * L + L) * itemsize),
        )(x2, pos2)

    return out2.reshape(B, S, D)


if __name__ == "__main__":
    # Module hyperparameters (small, consistent with the forward contract).
    MAX_LEN = 16
    DMODEL = 32
    DROPOUT = 0.1
    PADDING_IDX = 0          # falsy -> no row zeroed, same as the PyTorch branch

    B, S = 2, 8

    key = jax.random.PRNGKey(0)
    k_emb, k_drop = jax.random.split(key)
    embedd = jax.random.normal(k_emb, (B, S, DMODEL), dtype=jnp.float32)
    pos_encoding = make_pos_encoding(MAX_LEN, DMODEL, PADDING_IDX)

    # 1) Eval-mode (dropout off): exact match against the reference.
    out_eval = positional_encoding_forward(
        embedd, pos_encoding, dropout_p=DROPOUT, training=False)
    out_eval = jax.block_until_ready(out_eval)
    ref = embedd + pos_encoding[None, :S, :]
    assert out_eval.shape == (B, S, DMODEL)
    assert bool(jnp.allclose(out_eval, ref, atol=1e-6)), "eval-mode mismatch"

    # 2) Training-mode: inverted dropout — every element is 0 or ref/(1-p).
    out_train = positional_encoding_forward(
        embedd, pos_encoding, dropout_p=DROPOUT, rng_key=k_drop, training=True)
    out_train = jax.block_until_ready(out_train)
    assert out_train.shape == (B, S, DMODEL)
    scaled_ref = ref / (1.0 - DROPOUT)
    ok = jnp.logical_or(jnp.isclose(out_train, 0.0, atol=1e-6),
                        jnp.isclose(out_train, scaled_ref, atol=1e-4, rtol=1e-4))
    assert bool(jnp.all(ok)), "training-mode dropout values inconsistent"

    print("KERNEL_OK")
</pallas_src>

<mosaic_0001>
module attributes {stable_mosaic.version = 11 : i64} {
  func.func @_add_pe_kernel(%arg0: i32, %arg1: i32, %arg2: memref<2x256xf32, #tpu.memory_space<vmem>>, %arg3: memref<1x256xf32, #tpu.memory_space<vmem>>, %arg4: memref<2x256xf32, #tpu.memory_space<vmem>>) attributes {dimension_semantics = [#tpu.dimension_semantics<parallel>, #tpu.dimension_semantics<parallel>], iteration_bounds = array<i64: 1, 1>, scalar_prefetch = 0 : i64, scratch_operands = 0 : i64, tpu.core_type = #tpu.core_type<tc>, window_params = [{transform_indices = @transform_0, window_bounds = array<i64: 2, 256>}, {transform_indices = @transform_1, window_bounds = array<i64: 1, 256>}, {transform_indices = @transform_2, window_bounds = array<i64: 2, 256>}]} {
    %c0 = arith.constant 0 : index
    %c0_0 = arith.constant 0 : index
    %0 = vector.load %arg2[%c0, %c0_0] : memref<2x256xf32, #tpu.memory_space<vmem>>, vector<2x256xf32>
    %c0_1 = arith.constant 0 : index
    %c0_2 = arith.constant 0 : index
    %1 = vector.load %arg3[%c0_1, %c0_2] : memref<1x256xf32, #tpu.memory_space<vmem>>, vector<1x256xf32>
    %2 = vector.broadcast %1 : vector<1x256xf32> to vector<2x256xf32>
    %3 = arith.addf %0, %2 : vector<2x256xf32>
    %c0_3 = arith.constant 0 : index
    %c0_4 = arith.constant 0 : index
    %4 = vector.load %arg4[%c0_3, %c0_4] : memref<2x256xf32, #tpu.memory_space<vmem>>, vector<2x256xf32>
    tpu.vector_store %arg4[%c0_3, %c0_4], %3 {strides = array<i32>} : memref<2x256xf32, #tpu.memory_space<vmem>>, vector<2x256xf32>,
    return
  }
  func.func @transform_0(%arg0: i32, %arg1: i32) -> (i32, i32) {
    %c0_i32 = arith.constant 0 : i32
    return %arg0, %arg1 : i32, i32
  }
  func.func @transform_1(%arg0: i32, %arg1: i32) -> (i32, i32) {
    %c0_i32 = arith.constant 0 : i32
    %c0_i32_0 = arith.constant 0 : i32
    return %c0_i32, %arg1 : i32, i32
  }
  func.func @transform_2(%arg0: i32, %arg1: i32) -> (i32, i32) {
    %c0_i32 = arith.constant 0 : i32
    return %arg0, %arg1 : i32, i32
  }
}

</mosaic_0001>

<bundles_post_ra>
// kernel: tpu_custom_call.1
= control target key start
LH: loop header
LB: loop body
LE: loop exit
PB: predicated region body
PF: predicated region fallthrough
CT: control target
= control target key end

     0   :  { %7 = vsyncpa [#allocation3], 0  ;;  %s177_s0 = inlined_call_operand.hbm [shape: f32[2,256], index: 0, kind: input, shape index: {}]   ;;  %s178_s1 = inlined_call_operand.hbm [shape: f32[1,256], index: 1, kind: input, shape index: {}]   ;;  %s179_s2 = inlined_call_operand.hbm [shape: f32[2,256], index: 2, kind: output, shape index: {}]  }
   0x1   :  { %8 = vsyncpa [#allocation6], 0 }
   0x2   :  { %9 = vsyncpa [#allocation4], 0  ;;  %s15_s11 = sshll.u32 %s177_s0, 4  ;;  %s150_s12 = smov [#allocation2]   ;;  %s16_s11 = int_to_ptr.hbm [resolvable:$true] %s15_s11 }
   0x3   :  { %s17_s13 = sshll.u32 %s150_s12, 4  ;;  %s26_s16 = sshll.u32 %s178_s1, 4  ;;  %s18_s13 = int_to_ptr.vmem [resolvable:$true] %s17_s13  ;;  %s27_s16 = int_to_ptr.hbm [resolvable:$true] %s26_s16 }
   0x4   :  { %20 = dma.hbm_to_vmem [thread:$0]  %s16_s11, 64, %s18_s13, [#allocation3]  }
   0x5   :  { %s151_s17 = smov [#allocation5]  }
   0x6   :  { %s28_s18 = sshll.u32 %s151_s17, 4  ;;  %s29_s18 = int_to_ptr.vmem [resolvable:$true] %s28_s18 }
   0x7   :  { %31 = dma.hbm_to_vmem [thread:$0]  %s27_s16, 32, %s29_s18, [#allocation6]  }
   0x8   :  { %144 = dma.done.wait [#allocation3], 64  }
   0x9   :  { %145 = vsyncadd [#allocation3], 4294967232 }
   0xa   :  { %146 = dma.done.wait [#allocation6], 32  }
   0xb   :  { %147 = vsyncadd [#allocation6], 4294967264  ;;  %v41_v0 = vld [vmem:[#allocation5] sm:$0x3]  ;;  %vm46_vm0 = vcmask 1041408   ;;  %s152_s0 = smov [#allocation7]  }
   0xc   :  { %v43_v1 = vperm.slane %v41_v0, 0  ;;  %v44_v2 = vperm.slane %v41_v0, 1  ;;  %v40_v3 = vld [vmem:[#allocation2] sm:$0xf]  ;;  %s56_s19 = sshll.u32 %s152_s0, 4  ;;  %s58_s21 = sshll.u32 %s179_s2, 4  ;;  %s57_s19 = int_to_ptr.vmem [resolvable:$true] %s56_s19  ;;  %s59_s21 = int_to_ptr.hbm [resolvable:$true] %s58_s21 }
   0xe   :  { %v45_v4 = vrot.slane %v44_v2, 6 }
  0x10   :  { %v47_v5 = vsel %vm46_vm0, %v43_v1, %v45_v4 }
  0x11   :  { %v49_v6 = vadd.f32 %v47_v5, %v40_v3 }
  0x13   :  { %50 = vst [vmem:[#allocation7] sm:$0xf] %v49_v6 }
  0x14   :  { %61 = dma.vmem_to_hbm [thread:$0]  %s57_s19, 64, %s59_s21, [#allocation4]  }
  0x15   :  { %148 = dma.done.wait [#allocation4], 64  }
  0x16   :  { %149 = vsyncadd [#allocation4], 4294967232 }
  0x17   :  { %66 = vsyncpa [#allocation3], 1 }
  0x18   :  { %67 = vsyncpa [#allocation6], 1 }
  0x19   :  { %68 = vsyncpa [#allocation4], 1 }

</bundles_post_ra>
